<compile_context>
chip_gen: v5e
topology: v5e:2x2
jax: 0.10.0
libtpu: 0.0.40
codegen_flags: <defaults>
</compile_context>

<pallas_src>
import jax
import jax.numpy as jnp
from jax.experimental import pallas as pl
from jax.experimental.pallas import tpu as pltpu

VOCAB = 1000
VOCAB_PAD = 1024   # next multiple of 128 (lane width)
EMB_DIM = 10
OUT_DIM = 10


def _round_up(x: int, m: int) -> int:
    return ((x + m - 1) // m) * m


def _fused_lookup_kernel(idx_ref, ftab_ref, out_ref):
    # idx_ref:  (TILE_N, 1)           int32   token ids for this tile
    # ftab_ref: (VOCAB_PAD, OUT_DIM)  float32 fused table (emb @ W.T + b), VMEM-resident
    # out_ref:  (TILE_N, OUT_DIM)     float32
    idx = idx_ref[...]                                           # (TILE_N, 1)
    tile_n = idx.shape[0]
    vpad = ftab_ref.shape[0]

    # Row lookup as one-hot @ fused_table so the contraction runs on the MXU.
    # vpad is a multiple of 128, so the iota/compare tiles and the MXU
    # contraction are fully aligned (no ragged lanes).
    iota = jax.lax.broadcasted_iota(jnp.int32, (tile_n, vpad), 1)    # (TILE_N, VPAD)
    one_hot = (idx == iota).astype(jnp.float32)                      # (TILE_N, VPAD)
    out_ref[...] = jnp.dot(one_hot, ftab_ref[...],
                           preferred_element_type=jnp.float32)       # (TILE_N, OUT_DIM)


def distributed_model_forward(x_ids, table, weight, bias, *, tile_n=512):
    """x_ids: (B, S) int32 -> (B, S, OUT_DIM) float32."""
    b, s = x_ids.shape
    n = b * s

    # Fold the Linear layer into the embedding table once (tiny: 1000x10),
    # then zero-pad the vocab axis to a multiple of 128 lanes.
    fused = (table @ weight.T + bias[None, :]).astype(jnp.float32)           # (VOCAB, OUT_DIM)
    fused_table = jnp.zeros((VOCAB_PAD, OUT_DIM), jnp.float32).at[:VOCAB].set(fused)

    # Tile the token dimension; pad to a multiple of the tile so every block is full.
    tile_n = min(tile_n, _round_up(n, 8))
    n_pad = _round_up(n, tile_n)
    ids = jnp.zeros((n_pad, 1), jnp.int32)
    ids = ids.at[:n, 0].set(x_ids.reshape(-1).astype(jnp.int32))

    grid = (n_pad // tile_n,)

    out = pl.pallas_call(
        _fused_lookup_kernel,
        out_shape=jax.ShapeDtypeStruct((n_pad, OUT_DIM), jnp.float32),
        grid_spec=pltpu.PrefetchScalarGridSpec(
            num_scalar_prefetch=0,
            grid=grid,
            in_specs=[
                pl.BlockSpec((tile_n, 1), lambda i: (i, 0)),             # per-tile ids (pipelined)
                pl.BlockSpec((VOCAB_PAD, OUT_DIM), lambda i: (0, 0)),    # resident fused table
            ],
            out_specs=pl.BlockSpec((tile_n, OUT_DIM), lambda i: (i, 0)),
        ),
        compiler_params=pltpu.CompilerParams(
            dimension_semantics=("parallel",),   # lets v7x's 2 TensorCores split the grid
        ),
    )(ids, fused_table)

    return out[:n].reshape(b, s, OUT_DIM)


if __name__ == "__main__":
    key = jax.random.PRNGKey(0)
    k_tab, k_w, k_b, k_x = jax.random.split(key, 4)

    # Deterministic parameter init (synthetic, mimics module __init__ shapes).
    table = jax.random.normal(k_tab, (VOCAB, EMB_DIM), dtype=jnp.float32)             # nn.Embedding(1000, 10)
    bound = 1.0 / (EMB_DIM ** 0.5)
    weight = jax.random.uniform(k_w, (OUT_DIM, EMB_DIM), jnp.float32, -bound, bound)  # nn.Linear(10, 10).weight
    bias = jax.random.uniform(k_b, (OUT_DIM,), jnp.float32, -bound, bound)            # nn.Linear(10, 10).bias

    # Small example input: batch=2, seq=8 integer token ids.
    x = jax.random.randint(k_x, (2, 8), 0, VOCAB, dtype=jnp.int32)

    y = distributed_model_forward(x, table, weight, bias)
    y = jax.block_until_ready(y)

    # Reference check in plain JAX (embedding lookup + linear).
    ref = jnp.take(table, x, axis=0) @ weight.T + bias
    assert y.shape == (2, 8, OUT_DIM)
    assert jnp.allclose(y, ref, atol=1e-5, rtol=1e-5)

    print("KERNEL_OK")
</pallas_src>

<mosaic_0001>
module attributes {stable_mosaic.version = 11 : i64} {
  func.func @_fused_lookup_kernel(%arg0: i32, %arg1: memref<16x1xi32, #tpu.memory_space<vmem>>, %arg2: memref<1024x10xf32, #tpu.memory_space<vmem>>, %arg3: memref<16x10xf32, #tpu.memory_space<vmem>>) attributes {dimension_semantics = [#tpu.dimension_semantics<parallel>], iteration_bounds = array<i64: 1>, scalar_prefetch = 0 : i64, scratch_operands = 0 : i64, tpu.core_type = #tpu.core_type<tc>, window_params = [{transform_indices = @transform_0, window_bounds = array<i64: 16, 1>}, {pipeline_mode = #tpu.pipeline_mode<synchronous>, transform_indices = @transform_1, window_bounds = array<i64: 1024, 10>}, {transform_indices = @transform_2, window_bounds = array<i64: 16, 10>}]} {
    %c0 = arith.constant 0 : index
    %c0_0 = arith.constant 0 : index
    %0 = vector.load %arg1[%c0, %c0_0] : memref<16x1xi32, #tpu.memory_space<vmem>>, vector<16x1xi32>
    %1 = tpu.iota {dimensions = array<i32: 1>} : vector<16x1024xi32>
    %2 = vector.broadcast %0 : vector<16x1xi32> to vector<16x1024xi32>
    %3 = arith.cmpi eq, %2, %1 : vector<16x1024xi32>
    %4 = arith.extui %3 : vector<16x1024xi1> to vector<16x1024xi32>
    %5 = arith.sitofp %4 : vector<16x1024xi32> to vector<16x1024xf32>
    %c0_1 = arith.constant 0 : index
    %c0_2 = arith.constant 0 : index
    %6 = vector.load %arg2[%c0_1, %c0_2] : memref<1024x10xf32, #tpu.memory_space<vmem>>, vector<1024x10xf32>
    %cst = arith.constant dense<0.000000e+00> : vector<16x10xf32>
    %7 = tpu.matmul %5, %6, %cst {dimension_numbers = #tpu.dot_dimension_numbers<[1], [0], [0], [1], [0, 0, 1, 1], [], []>} : vector<16x1024xf32>, vector<1024x10xf32>, vector<16x10xf32> -> vector<16x10xf32>
    %c0_3 = arith.constant 0 : index
    %c0_4 = arith.constant 0 : index
    %8 = vector.load %arg3[%c0_3, %c0_4] : memref<16x10xf32, #tpu.memory_space<vmem>>, vector<16x10xf32>
    tpu.vector_store %arg3[%c0_3, %c0_4], %7 {strides = array<i32>} : memref<16x10xf32, #tpu.memory_space<vmem>>, vector<16x10xf32>,
    return
  }
  func.func @transform_0(%arg0: i32) -> (i32, i32) {
    %c0_i32 = arith.constant 0 : i32
    %c0_i32_0 = arith.constant 0 : i32
    return %arg0, %c0_i32 : i32, i32
  }
  func.func @transform_1(%arg0: i32) -> (i32, i32) {
    %c0_i32 = arith.constant 0 : i32
    %c0_i32_0 = arith.constant 0 : i32
    %c0_i32_1 = arith.constant 0 : i32
    return %c0_i32, %c0_i32_0 : i32, i32
  }
  func.func @transform_2(%arg0: i32) -> (i32, i32) {
    %c0_i32 = arith.constant 0 : i32
    %c0_i32_0 = arith.constant 0 : i32
    return %arg0, %c0_i32 : i32, i32
  }
}

</mosaic_0001>

<bundles_post_ra>
// kernel: tpu_custom_call.1
= control target key start
LH: loop header
LB: loop body
LE: loop exit
PB: predicated region body
PF: predicated region fallthrough
CT: control target
= control target key end

     0   :  { %v474_v2 = vmov 0   ;;  %s887_s0 = inlined_call_operand.vmem [shape: s32[16,1], index: 0, kind: input, shape index: {}]   ;;  %s888_s1 = inlined_call_operand.vmem [shape: f32[1024,10], index: 1, kind: input, shape index: {}]   ;;  %s889_s2 = inlined_call_operand.hbm [shape: f32[16,10], index: 2, kind: output, shape index: {}]  }
   0x1   :  { %v12_v0 = vld [vmem:[%s887_s0] sm:$0xff]  ;;  %v92_v1 = vld [vmem:[%s888_s1 + $0x78] sm:$0xff]  ;;  %447 = vset.pattern.permute.xlu0 %v474_v2  ;;  %v91_v6 = vld [vmem:[%s888_s1 + $0x70] sm:$0xff] }
   0x2   :  { %205 = vmatpush.msra.mxu0 %v92_v1  ;;  %v108_v3 = vld [vmem:[%s888_s1 + $0xf8] sm:$0xff]  ;;  %24 = vperm.xlu0 %447, %v12_v0   ;;  %v107_v7 = vld [vmem:[%s888_s1 + $0xf0] sm:$0xff]  ;;  %v90_v10 = vld [vmem:[%s888_s1 + $0x68] sm:$0xff] }
   0x3   :  { %v124_v4 = vld [vmem:[%s888_s1 + $0x178] sm:$0xff]  ;;  %228 = vmatpush.msra.mxu1 %v108_v3  ;;  %v123_v8 = vld [vmem:[%s888_s1 + $0x170] sm:$0xff]  ;;  %v106_v11 = vld [vmem:[%s888_s1 + $0xe8] sm:$0xff] }
   0x4   :  { %v140_v5 = vld [vmem:[%s888_s1 + $0x1f8] sm:$0xff]  ;;  %251 = vmatpush.msra.mxu2 %v124_v4  ;;  %v139_v9 = vld [vmem:[%s888_s1 + $0x1f0] sm:$0xff]  ;;  %206 = vmatpush.msra.mxu0 %v91_v6  ;;  %v122_v12 = vld [vmem:[%s888_s1 + $0x168] sm:$0xff] }
   0x5   :  { %274 = vmatpush.msra.mxu3 %v140_v5  ;;  %229 = vmatpush.msra.mxu1 %v107_v7  ;;  %v138_v13 = vld [vmem:[%s888_s1 + $0x1e8] sm:$0xff]  ;;  %v89_v14 = vld [vmem:[%s888_s1 + $0x60] sm:$0xff]  ;;  %v88_v19 = vld [vmem:[%s888_s1 + $0x58] sm:$0xff] }
   0x6   :  { %252 = vmatpush.msra.mxu2 %v123_v8  ;;  %v105_v15 = vld [vmem:[%s888_s1 + $0xe0] sm:$0xff]  ;;  %207 = vmatpush.msra.mxu0 %v90_v10  ;;  %v13_v18 = vld [vmem:[%s887_s0 + $0x8] sm:$0xff]  ;;  %v104_v20 = vld [vmem:[%s888_s1 + $0xd8] sm:$0xff] }
   0x7   :  { %275 = vmatpush.msra.mxu3 %v139_v9  ;;  %230 = vmatpush.msra.mxu1 %v106_v11  ;;  %v121_v16 = vld [vmem:[%s888_s1 + $0x160] sm:$0xff]  ;;  %v120_v21 = vld [vmem:[%s888_s1 + $0x158] sm:$0xff]  ;;  %v87_v23 = vld [vmem:[%s888_s1 + $0x50] sm:$0xff] }
   0x8   :  { %v137_v17 = vld [vmem:[%s888_s1 + $0x1e0] sm:$0xff]  ;;  %253 = vmatpush.msra.mxu2 %v122_v12  ;;  %208 = vmatpush.msra.mxu0 %v89_v14  ;;  %v136_v22 = vld [vmem:[%s888_s1 + $0x1d8] sm:$0xff]  ;;  %v103_v24 = vld [vmem:[%s888_s1 + $0xd0] sm:$0xff] }
   0x9   :  { %276 = vmatpush.msra.mxu3 %v138_v13  ;;  %231 = vmatpush.msra.mxu1 %v105_v15  ;;  %v119_v25 = vld [vmem:[%s888_s1 + $0x150] sm:$0xff]  ;;  %v86_v27 = vld [vmem:[%s888_s1 + $0x48] sm:$0xff]  ;;  %v85_v31 = vld [vmem:[%s888_s1 + $0x40] sm:$0xff] }
   0xa   :  { %254 = vmatpush.msra.mxu2 %v121_v16  ;;  %27 = vperm.xlu0 %447, %v13_v18   ;;  %v135_v26 = vld [vmem:[%s888_s1 + $0x1d0] sm:$0xff]  ;;  %v102_v28 = vld [vmem:[%s888_s1 + $0xc8] sm:$0xff]  ;;  %v101_v32 = vld [vmem:[%s888_s1 + $0xc0] sm:$0xff] }
   0xb   :  { %277 = vmatpush.msra.mxu3 %v137_v17  ;;  %209 = vmatpush.msra.mxu0 %v88_v19  ;;  %v118_v29 = vld [vmem:[%s888_s1 + $0x148] sm:$0xff]  ;;  %v117_v33 = vld [vmem:[%s888_s1 + $0x140] sm:$0xff]  ;;  %v84_v35 = vld [vmem:[%s888_s1 + $0x38] sm:$0xff] }
   0xc   :  { %232 = vmatpush.msra.mxu1 %v104_v20  ;;  %255 = vmatpush.msra.mxu2 %v120_v21  ;;  %v134_v30 = vld [vmem:[%s888_s1 + $0x1c8] sm:$0xff]  ;;  %v133_v34 = vld [vmem:[%s888_s1 + $0x1c0] sm:$0xff]  ;;  %v100_v36 = vld [vmem:[%s888_s1 + $0xb8] sm:$0xff] }
   0xd   :  { %278 = vmatpush.msra.mxu3 %v136_v22  ;;  %210 = vmatpush.msra.mxu0 %v87_v23  ;;  %v116_v37 = vld [vmem:[%s888_s1 + $0x138] sm:$0xff]  ;;  %v83_v39 = vld [vmem:[%s888_s1 + $0x30] sm:$0xff]  ;;  %v82_v43 = vld [vmem:[%s888_s1 + $0x28] sm:$0xff] }
   0xe   :  { %233 = vmatpush.msra.mxu1 %v103_v24  ;;  %256 = vmatpush.msra.mxu2 %v119_v25  ;;  %v132_v38 = vld [vmem:[%s888_s1 + $0x1b8] sm:$0xff]  ;;  %v99_v40 = vld [vmem:[%s888_s1 + $0xb0] sm:$0xff]  ;;  %v98_v44 = vld [vmem:[%s888_s1 + $0xa8] sm:$0xff] }
   0xf   :  { %279 = vmatpush.msra.mxu3 %v135_v26  ;;  %211 = vmatpush.msra.mxu0 %v86_v27  ;;  %v115_v41 = vld [vmem:[%s888_s1 + $0x130] sm:$0xff]  ;;  %v114_v45 = vld [vmem:[%s888_s1 + $0x128] sm:$0xff]  ;;  %v81_v47 = vld [vmem:[%s888_s1 + $0x20] sm:$0xff] }
  0x10   :  { %234 = vmatpush.msra.mxu1 %v102_v28  ;;  %257 = vmatpush.msra.mxu2 %v118_v29  ;;  %v131_v42 = vld [vmem:[%s888_s1 + $0x1b0] sm:$0xff]  ;;  %v130_v46 = vld [vmem:[%s888_s1 + $0x1a8] sm:$0xff]  ;;  %v97_v48 = vld [vmem:[%s888_s1 + $0xa0] sm:$0xff] }
  0x11   :  { %280 = vmatpush.msra.mxu3 %v134_v30  ;;  %212 = vmatpush.msra.mxu0 %v85_v31  ;;  %v113_v49 = vld [vmem:[%s888_s1 + $0x120] sm:$0xff]  ;;  %v80_v51 = vld [vmem:[%s888_s1 + $0x18] sm:$0xff]  ;;  %v79_v55 = vld [vmem:[%s888_s1 + $0x10] sm:$0xff] }
  0x12   :  { %235 = vmatpush.msra.mxu1 %v101_v32  ;;  %258 = vmatpush.msra.mxu2 %v117_v33  ;;  %v129_v50 = vld [vmem:[%s888_s1 + $0x1a0] sm:$0xff]  ;;  %v96_v52 = vld [vmem:[%s888_s1 + $0x98] sm:$0xff]  ;;  %v95_v56 = vld [vmem:[%s888_s1 + $0x90] sm:$0xff] }
  0x13   :  { %281 = vmatpush.msra.mxu3 %v133_v34  ;;  %213 = vmatpush.msra.mxu0 %v84_v35  ;;  %v112_v53 = vld [vmem:[%s888_s1 + $0x118] sm:$0xff]  ;;  %v111_v57 = vld [vmem:[%s888_s1 + $0x110] sm:$0xff]  ;;  %v78_v59 = vld [vmem:[%s888_s1 + $0x8] sm:$0xff] }
  0x14   :  { %236 = vmatpush.msra.mxu1 %v100_v36  ;;  %259 = vmatpush.msra.mxu2 %v116_v37  ;;  %v128_v54 = vld [vmem:[%s888_s1 + $0x198] sm:$0xff]  ;;  %v127_v58 = vld [vmem:[%s888_s1 + $0x190] sm:$0xff]  ;;  %v94_v60 = vld [vmem:[%s888_s1 + $0x88] sm:$0xff] }
  0x15   :  { %282 = vmatpush.msra.mxu3 %v132_v38  ;;  %214 = vmatpush.msra.mxu0 %v83_v39  ;;  %v110_v61 = vld [vmem:[%s888_s1 + $0x108] sm:$0xff]  ;;  %v77_v63 = vld [vmem:[%s888_s1] sm:$0xff]  ;;  %v156_v3 = vld [vmem:[%s888_s1 + $0x278] sm:$0xff] }
  0x16   :  { %237 = vmatpush.msra.mxu1 %v99_v40  ;;  %260 = vmatpush.msra.mxu2 %v115_v41  ;;  %v126_v62 = vld [vmem:[%s888_s1 + $0x188] sm:$0xff]  ;;  %v93_v0 = vld [vmem:[%s888_s1 + $0x80] sm:$0xff] }
  0x17   :  { %283 = vmatpush.msra.mxu3 %v131_v42  ;;  %215 = vmatpush.msra.mxu0 %v82_v43  ;;  %v109_v1 = vld [vmem:[%s888_s1 + $0x100] sm:$0xff] }
  0x18   :  { %238 = vmatpush.msra.mxu1 %v98_v44  ;;  %261 = vmatpush.msra.mxu2 %v114_v45  ;;  %v125_v2 = vld [vmem:[%s888_s1 + $0x180] sm:$0xff] }
  0x19   :  { %284 = vmatpush.msra.mxu3 %v130_v46  ;;  %216 = vmatpush.msra.mxu0 %v81_v47 }
  0x1a   :  { %239 = vmatpush.msra.mxu1 %v97_v48  ;;  %262 = vmatpush.msra.mxu2 %v113_v49 }
  0x1b   :  { %285 = vmatpush.msra.mxu3 %v129_v50  ;;  %217 = vmatpush.msra.mxu0 %v80_v51 }
  0x1c   :  { %240 = vmatpush.msra.mxu1 %v96_v52  ;;  %263 = vmatpush.msra.mxu2 %v112_v53 }
  0x1d   :  { %286 = vmatpush.msra.mxu3 %v128_v54  ;;  %218 = vmatpush.msra.mxu0 %v79_v55 }
  0x1e   :  { %241 = vmatpush.msra.mxu1 %v95_v56  ;;  %264 = vmatpush.msra.mxu2 %v111_v57 }
  0x1f   :  { %287 = vmatpush.msra.mxu3 %v127_v58  ;;  %219 = vmatpush.msra.mxu0 %v78_v59 }
  0x20   :  { %242 = vmatpush.msra.mxu1 %v94_v60  ;;  %265 = vmatpush.msra.mxu2 %v110_v61 }
  0x21   :  { %7 = vsyncpa [#allocation3], 0  ;;  %288 = vmatpush.msra.mxu3 %v126_v62  ;;  %220 = vmatpush.msra.mxu0 %v77_v63  ;;  %v172_v4 = vld [vmem:[%s888_s1 + $0x2f8] sm:$0xff]  ;;  %v155_v7 = vld [vmem:[%s888_s1 + $0x270] sm:$0xff]  ;;  %s398_s12 = sshll.u32 %s889_s2, 4  ;;  %s477_s13 = smov 128   ;;  %s399_s12 = int_to_ptr.hbm [resolvable:$true] %s398_s12 }
  0x22   :  { %v188_v5 = vld [vmem:[%s888_s1 + $0x378] sm:$0xff]  ;;  %243 = vmatpush.msra.mxu1 %v93_v0  ;;  %266 = vmatpush.msra.mxu2 %v109_v1  ;;  %v171_v8 = vld [vmem:[%s888_s1 + $0x2f0] sm:$0xff]  ;;  %v154_v11 = vld [vmem:[%s888_s1 + $0x268] sm:$0xff]  ;;  %s478_s14 = smov 8  }
  0x23   :  { %v204_v6 = vld [vmem:[%s888_s1 + $0x3f8] sm:$0xff]  ;;  %289 = vmatpush.msra.mxu3 %v125_v2  ;;  %297 = vmatpush.msrb.mxu0 %v156_v3  ;;  %v187_v9 = vld [vmem:[%s888_s1 + $0x370] sm:$0xff]  ;;  %v170_v12 = vld [vmem:[%s888_s1 + $0x2e8] sm:$0xff]  ;;  %v14_v3 = vlaneseq }
  0x24   :  { %320 = vmatpush.msrb.mxu1 %v172_v4  ;;  %343 = vmatpush.msrb.mxu2 %v188_v5  ;;  %v203_v10 = vld [vmem:[%s888_s1 + $0x3f0] sm:$0xff]  ;;  %v186_v13 = vld [vmem:[%s888_s1 + $0x368] sm:$0xff]  ;;  %v153_v15 = vld [vmem:[%s888_s1 + $0x260] sm:$0xff] }
  0x25   :  { %366 = vmatpush.msrb.mxu3 %v204_v6  ;;  %298 = vmatpush.msrb.mxu0 %v155_v7  ;;  %v202_v14 = vld [vmem:[%s888_s1 + $0x3e8] sm:$0xff]  ;;  %v169_v16 = vld [vmem:[%s888_s1 + $0x2e0] sm:$0xff]  ;;  %v152_v19 = vld [vmem:[%s888_s1 + $0x258] sm:$0xff]  ;;  %v15_v4 = vand.u32 127, %v14_v3 }
  0x26   :  { %321 = vmatpush.msrb.mxu1 %v171_v8  ;;  %344 = vmatpush.msrb.mxu2 %v187_v9  ;;  %v185_v17 = vld [vmem:[%s888_s1 + $0x360] sm:$0xff]  ;;  %v168_v20 = vld [vmem:[%s888_s1 + $0x2d8] sm:$0xff]  ;;  %v151_v23 = vld [vmem:[%s888_s1 + $0x250] sm:$0xff]  ;;  %v475_v9 = vmov 1.0  }
  0x27   :  { %367 = vmatpush.msrb.mxu3 %v203_v10  ;;  %299 = vmatpush.msrb.mxu0 %v154_v11  ;;  %v201_v18 = vld [vmem:[%s888_s1 + $0x3e0] sm:$0xff]  ;;  %v184_v21 = vld [vmem:[%s888_s1 + $0x358] sm:$0xff]  ;;  %v167_v24 = vld [vmem:[%s888_s1 + $0x2d0] sm:$0xff]  ;;  %v16_v5 = vadd.s32 128, %v15_v4  ;;  %v17_v6 = vadd.s32 256, %v15_v4  ;;  %v18_v7 = vadd.s32 384, %v15_v4 }
  0x28   :  { %322 = vmatpush.msrb.mxu1 %v170_v12  ;;  %345 = vmatpush.msrb.mxu2 %v186_v13  ;;  %v200_v22 = vld [vmem:[%s888_s1 + $0x3d8] sm:$0xff]  ;;  %v183_v25 = vld [vmem:[%s888_s1 + $0x350] sm:$0xff]  ;;  %v150_v27 = vld [vmem:[%s888_s1 + $0x248] sm:$0xff]  ;;  %v19_v11 = vadd.s32 512, %v15_v4  ;;  %v20_v12 = vadd.s32 640, %v15_v4  ;;  %v21_v13 = vadd.s32 768, %v15_v4 }
  0x29   :  { %368 = vmatpush.msrb.mxu3 %v202_v14  ;;  %300 = vmatpush.msrb.mxu0 %v153_v15  ;;  %v199_v26 = vld [vmem:[%s888_s1 + $0x3d0] sm:$0xff]  ;;  %v166_v28 = vld [vmem:[%s888_s1 + $0x2c8] sm:$0xff]  ;;  %v149_v31 = vld [vmem:[%s888_s1 + $0x240] sm:$0xff]  ;;  %v22_v14 = vadd.s32 896, %v15_v4 }
  0x2a   :  { %323 = vmatpush.msrb.mxu1 %v169_v16  ;;  %346 = vmatpush.msrb.mxu2 %v185_v17  ;;  %v182_v29 = vld [vmem:[%s888_s1 + $0x348] sm:$0xff]  ;;  %v165_v32 = vld [vmem:[%s888_s1 + $0x2c0] sm:$0xff]  ;;  %v148_v35 = vld [vmem:[%s888_s1 + $0x238] sm:$0xff] }
  0x2b   :  { %369 = vmatpush.msrb.mxu3 %v201_v18  ;;  %301 = vmatpush.msrb.mxu0 %v152_v19  ;;  %v198_v30 = vld [vmem:[%s888_s1 + $0x3c8] sm:$0xff]  ;;  %v181_v33 = vld [vmem:[%s888_s1 + $0x340] sm:$0xff]  ;;  %v164_v36 = vld [vmem:[%s888_s1 + $0x2b8] sm:$0xff] }
  0x2c   :  { %324 = vmatpush.msrb.mxu1 %v168_v20  ;;  %347 = vmatpush.msrb.mxu2 %v184_v21  ;;  %v197_v34 = vld [vmem:[%s888_s1 + $0x3c0] sm:$0xff]  ;;  %v180_v37 = vld [vmem:[%s888_s1 + $0x338] sm:$0xff]  ;;  %v147_v39 = vld [vmem:[%s888_s1 + $0x230] sm:$0xff] }
  0x2d   :  { %370 = vmatpush.msrb.mxu3 %v200_v22  ;;  %302 = vmatpush.msrb.mxu0 %v151_v23  ;;  %v196_v38 = vld [vmem:[%s888_s1 + $0x3b8] sm:$0xff]  ;;  %v163_v40 = vld [vmem:[%s888_s1 + $0x2b0] sm:$0xff]  ;;  %v146_v43 = vld [vmem:[%s888_s1 + $0x228] sm:$0xff] }
  0x2e   :  { %325 = vmatpush.msrb.mxu1 %v167_v24  ;;  %348 = vmatpush.msrb.mxu2 %v183_v25  ;;  %v179_v41 = vld [vmem:[%s888_s1 + $0x330] sm:$0xff]  ;;  %v162_v44 = vld [vmem:[%s888_s1 + $0x2a8] sm:$0xff]  ;;  %v145_v47 = vld [vmem:[%s888_s1 + $0x220] sm:$0xff] }
  0x2f   :  { %371 = vmatpush.msrb.mxu3 %v199_v26  ;;  %303 = vmatpush.msrb.mxu0 %v150_v27  ;;  %v195_v42 = vld [vmem:[%s888_s1 + $0x3b0] sm:$0xff]  ;;  %v178_v45 = vld [vmem:[%s888_s1 + $0x328] sm:$0xff]  ;;  %v161_v48 = vld [vmem:[%s888_s1 + $0x2a0] sm:$0xff] }
  0x30   :  { %326 = vmatpush.msrb.mxu1 %v166_v28  ;;  %349 = vmatpush.msrb.mxu2 %v182_v29  ;;  %v194_v46 = vld [vmem:[%s888_s1 + $0x3a8] sm:$0xff]  ;;  %v177_v49 = vld [vmem:[%s888_s1 + $0x320] sm:$0xff]  ;;  %v144_v51 = vld [vmem:[%s888_s1 + $0x218] sm:$0xff] }
  0x31   :  { %372 = vmatpush.msrb.mxu3 %v198_v30  ;;  %304 = vmatpush.msrb.mxu0 %v149_v31  ;;  %v193_v50 = vld [vmem:[%s888_s1 + $0x3a0] sm:$0xff]  ;;  %v160_v52 = vld [vmem:[%s888_s1 + $0x298] sm:$0xff]  ;;  %v143_v55 = vld [vmem:[%s888_s1 + $0x210] sm:$0xff] }
  0x32   :  { %327 = vmatpush.msrb.mxu1 %v165_v32  ;;  %350 = vmatpush.msrb.mxu2 %v181_v33  ;;  %v176_v53 = vld [vmem:[%s888_s1 + $0x318] sm:$0xff]  ;;  %v159_v56 = vld [vmem:[%s888_s1 + $0x290] sm:$0xff]  ;;  %v142_v59 = vld [vmem:[%s888_s1 + $0x208] sm:$0xff] }
  0x33   :  { %373 = vmatpush.msrb.mxu3 %v197_v34  ;;  %305 = vmatpush.msrb.mxu0 %v148_v35  ;;  %v192_v54 = vld [vmem:[%s888_s1 + $0x398] sm:$0xff]  ;;  %v175_v57 = vld [vmem:[%s888_s1 + $0x310] sm:$0xff]  ;;  %v158_v60 = vld [vmem:[%s888_s1 + $0x288] sm:$0xff] }
  0x34   :  { %328 = vmatpush.msrb.mxu1 %v164_v36  ;;  %351 = vmatpush.msrb.mxu2 %v180_v37  ;;  %v191_v58 = vld [vmem:[%s888_s1 + $0x390] sm:$0xff]  ;;  %v174_v61 = vld [vmem:[%s888_s1 + $0x308] sm:$0xff]  ;;  %v141_v63 = vld [vmem:[%s888_s1 + $0x200] sm:$0xff] }
  0x35   :  { %374 = vmatpush.msrb.mxu3 %v196_v38  ;;  %306 = vmatpush.msrb.mxu0 %v147_v39  ;;  %v190_v62 = vld [vmem:[%s888_s1 + $0x388] sm:$0xff]  ;;  %v157_v0 = vld [vmem:[%s888_s1 + $0x280] sm:$0xff] }
  0x36   :  { %329 = vmatpush.msrb.mxu1 %v163_v40  ;;  %352 = vmatpush.msrb.mxu2 %v179_v41  ;;  %v173_v1 = vld [vmem:[%s888_s1 + $0x300] sm:$0xff] }
  0x37   :  { %375 = vmatpush.msrb.mxu3 %v195_v42  ;;  %307 = vmatpush.msrb.mxu0 %v146_v43  ;;  %v189_v2 = vld [vmem:[%s888_s1 + $0x380] sm:$0xff]  ;;  %s476_s1 = smov [#allocation2]  }
  0x38   :  { %330 = vmatpush.msrb.mxu1 %v162_v44  ;;  %353 = vmatpush.msrb.mxu2 %v178_v45  ;;  %s396_s9 = sshll.u32 %s476_s1, 4  ;;  %s397_s9 = int_to_ptr.vmem [resolvable:$true] %s396_s9 }
  0x39   :  { %376 = vmatpush.msrb.mxu3 %v194_v46  ;;  %308 = vmatpush.msrb.mxu0 %v145_v47 }
  0x3a   :  { %331 = vmatpush.msrb.mxu1 %v161_v48  ;;  %354 = vmatpush.msrb.mxu2 %v177_v49 }
  0x3b   :  { %377 = vmatpush.msrb.mxu3 %v193_v50  ;;  %309 = vmatpush.msrb.mxu0 %v144_v51 }
  0x3c   :  { %332 = vmatpush.msrb.mxu1 %v160_v52  ;;  %355 = vmatpush.msrb.mxu2 %v176_v53 }
  0x3d   :  { %378 = vmatpush.msrb.mxu3 %v192_v54  ;;  %310 = vmatpush.msrb.mxu0 %v143_v55 }
  0x3e   :  { %333 = vmatpush.msrb.mxu1 %v159_v56  ;;  %356 = vmatpush.msrb.mxu2 %v175_v57 }
  0x3f   :  { %379 = vmatpush.msrb.mxu3 %v191_v58  ;;  %311 = vmatpush.msrb.mxu0 %v142_v59 }
  0x40   :  { %334 = vmatpush.msrb.mxu1 %v158_v60  ;;  %357 = vmatpush.msrb.mxu2 %v174_v61 }
  0x41   :  { %380 = vmatpush.msrb.mxu3 %v190_v62  ;;  %312 = vmatpush.msrb.mxu0 %v141_v63 }
  0x42   :  { %335 = vmatpush.msrb.mxu1 %v157_v0  ;;  %358 = vmatpush.msrb.mxu2 %v173_v1 }
  0x43   :  { %381 = vmatpush.msrb.mxu3 %v189_v2 }
  0x74   :  { %v25_v8 = vpop.permute.xlu0 %24 }
  0x75   :  { %vm29_vm0 = vcmp.eq.s32.totalorder %v25_v8, %v15_v4  ;;  %vm30_vm1 = vcmp.eq.s32.totalorder %v25_v8, %v16_v5  ;;  %vm31_vm2 = vcmp.eq.s32.totalorder %v25_v8, %v17_v6  ;;  %vm32_vm3 = vcmp.eq.s32.totalorder %v25_v8, %v18_v7 }
  0x76   :  { %426 = vmatmul.msk.f32.vlgmr.msra.gmra.mxu0 %vm29_vm0, %v475_v9  ;;  %428 = vmatmul.msk.f32.vlgmr.msra.gmra.mxu1 %vm30_vm1, %v475_v9  ;;  %vm33_vm8 = vcmp.eq.s32.totalorder %v25_v8, %v19_v11  ;;  %vm34_vm9 = vcmp.eq.s32.totalorder %v25_v8, %v20_v12  ;;  %vm35_vm10 = vcmp.eq.s32.totalorder %v25_v8, %v21_v13  ;;  %vm389_vm0 = vcmask 80896  }
  0x77   :  { %430 = vmatmul.msk.f32.vlgmr.msra.gmra.mxu2 %vm31_vm2, %v475_v9  ;;  %432 = vmatmul.msk.f32.vlgmr.msra.gmra.mxu3 %vm32_vm3, %v475_v9  ;;  %vm36_vm11 = vcmp.eq.s32.totalorder %v25_v8, %v22_v14 }
  0x7c   :  { %v28_v10 = vpop.permute.xlu0 %27 }
  0x7d   :  { %vm37_vm4 = vcmp.eq.s32.totalorder %v28_v10, %v15_v4  ;;  %vm38_vm5 = vcmp.eq.s32.totalorder %v28_v10, %v16_v5  ;;  %vm39_vm6 = vcmp.eq.s32.totalorder %v28_v10, %v17_v6  ;;  %vm40_vm7 = vcmp.eq.s32.totalorder %v28_v10, %v18_v7 }
  0x7e   :  { %427 = vmatmul.msk.f32.gmra.mxu0 %vm37_vm4, %v475_v9  ;;  %429 = vmatmul.msk.f32.gmra.mxu1 %vm38_vm5, %v475_v9  ;;  %vm41_vm12 = vcmp.eq.s32.totalorder %v28_v10, %v19_v11  ;;  %vm42_vm13 = vcmp.eq.s32.totalorder %v28_v10, %v20_v12  ;;  %vm43_vm14 = vcmp.eq.s32.totalorder %v28_v10, %v21_v13 }
  0x7f   :  { %431 = vmatmul.msk.f32.gmra.mxu2 %vm39_vm6, %v475_v9  ;;  %433 = vmatmul.msk.f32.gmra.mxu3 %vm40_vm7, %v475_v9  ;;  %vm44_vm15 = vcmp.eq.s32.totalorder %v28_v10, %v22_v14 }
  0x86   :  { %434 = vmatmul.msk.f32.vlgmr.msrb.gmra.mxu0 %vm33_vm8, %v475_v9  ;;  %436 = vmatmul.msk.f32.vlgmr.msrb.gmra.mxu1 %vm34_vm9, %v475_v9 }
  0x87   :  { %438 = vmatmul.msk.f32.vlgmr.msrb.gmra.mxu2 %vm35_vm10, %v475_v9  ;;  %440 = vmatmul.msk.f32.vlgmr.msrb.gmra.mxu3 %vm36_vm11, %v475_v9 }
  0x8e   :  { %435 = vmatmul.msk.f32.gmra.mxu0 %vm41_vm12, %v475_v9  ;;  %437 = vmatmul.msk.f32.gmra.mxu1 %vm42_vm13, %v475_v9 }
  0x8f   :  { %439 = vmatmul.msk.f32.gmra.mxu2 %vm43_vm14, %v475_v9  ;;  %441 = vmatmul.msk.f32.gmra.mxu3 %vm44_vm15, %v475_v9 }
  0xf3   :  { %v222_v15 = vpop.f32.mrf.mxu0  ;;  %v245_v16 = vpop.f32.mrf.mxu1 }
  0xf4   :  { %v246_v21 = vadd.f32 %v245_v16, %v222_v15 }
  0xfa   :  { %v268_v17 = vpop.f32.mrf.mxu2  ;;  %v291_v18 = vpop.f32.mrf.mxu3 }
  0xfb   :  { %v225_v19 = vpop.f32.mrf.mxu0  ;;  %v248_v20 = vpop.f32.mrf.mxu1  ;;  %v269_v22 = vadd.f32 %v268_v17, %v246_v21 }
  0xfc   :  { %v249_v27 = vadd.f32 %v248_v20, %v225_v19 }
  0xfd   :  { %v292_v25 = vadd.f32 %v291_v18, %v269_v22 }
 0x102   :  { %v271_v23 = vpop.f32.mrf.mxu2  ;;  %v294_v24 = vpop.f32.mrf.mxu3 }
 0x103   :  { %v314_v26 = vpop.f32.mrf.mxu0  ;;  %v337_v29 = vpop.f32.mrf.mxu1  ;;  %v272_v30 = vadd.f32 %v271_v23, %v249_v27 }
 0x104   :  { %v315_v28 = vadd.f32 %v314_v26, %v292_v25 }
 0x105   :  { %v295_v34 = vadd.f32 %v294_v24, %v272_v30 }
 0x106   :  { %v338_v31 = vadd.f32 %v337_v29, %v315_v28 }
 0x10a   :  { %v360_v32 = vpop.f32.mrf.mxu2  ;;  %v383_v33 = vpop.f32.mrf.mxu3 }
 0x10b   :  { %v361_v35 = vadd.f32 %v360_v32, %v338_v31  ;;  %v317_v36 = vpop.f32.mrf.mxu0  ;;  %v340_v39 = vpop.f32.mrf.mxu1 }
 0x10c   :  { %v318_v38 = vadd.f32 %v317_v36, %v295_v34 }
 0x10d   :  { %v384_v37 = vadd.f32 %v383_v33, %v361_v35 }
 0x10e   :  { %v341_v40 = vadd.f32 %v340_v39, %v318_v38 }
 0x10f   :  { %390 = vst.msk [vmem:[#allocation2] sm:$0xff] %vm389_vm0, %v384_v37 }
 0x112   :  { %v363_v41 = vpop.f32.mrf.mxu2  ;;  %v386_v43 = vpop.f32.mrf.mxu3 }
 0x113   :  { %v364_v42 = vadd.f32 %v363_v41, %v341_v40 }
 0x115   :  { %v387_v44 = vadd.f32 %v386_v43, %v364_v42 }
 0x117   :  { %391 = vst.msk [vmem:[#allocation2 + $0x8] sm:$0xff] %vm389_vm0, %v387_v44 }
 0x118   :  { %404 = dma.vmem_to_hbm [thread:$0]  %s397_s9, 256, %s399_s12, [#allocation3], %s477_s13, %s477_s13, %s478_s14  }
 0x119   :  { %472 = dma.done.wait [#allocation3], 256  }
 0x11a   :  { %473 = vsyncadd [#allocation3], 4294967040 }
 0x11b   :  { %409 = vsyncpa [#allocation3], 1 }

</bundles_post_ra>
